<compile_context>
chip_gen: v6e
topology: v6e:2x2x1
jax: 0.10.0
libtpu: 0.0.40
codegen_flags: <defaults>
</compile_context>

<pallas_src>
import functools

import numpy as np
import jax
import jax.numpy as jnp
from jax.experimental import pallas as pl
from jax.experimental.pallas import tpu as pltpu

LANE = 128


def _round_up(n, m):
    return ((n + m - 1) // m) * m


def actor_kernel(x_ref, w1_ref, b1_ref, w2_ref, b2_ref, w3_ref, b3_ref,
                 o_ref, *, scale):
    # x tile: (TB, IN) f32 -> bf16 for the MXU; accumulate in f32.
    x = x_ref[...].astype(jnp.bfloat16)

    # Layer 1: Linear + ReLU (bias/ReLU in f32 on the VPU)
    h1 = jnp.dot(x, w1_ref[...], preferred_element_type=jnp.float32)
    h1 = jnp.maximum(h1 + b1_ref[...], 0.0)

    # Layer 2: Linear + ReLU
    h2 = jnp.dot(h1.astype(jnp.bfloat16), w2_ref[...],
                 preferred_element_type=jnp.float32)
    h2 = jnp.maximum(h2 + b2_ref[...], 0.0)

    # Output layer: Linear + tanh (EUP), then static scale
    h3 = jnp.dot(h2.astype(jnp.bfloat16), w3_ref[...],
                 preferred_element_type=jnp.float32)
    h3 = h3 + b3_ref[...]
    o_ref[...] = (jnp.tanh(h3) * scale).astype(o_ref.dtype)


def pack_actor_params(params):
    """Pad feature dims to multiples of 128 (lane-dense) and cast weights to
    bf16.  Zero padding is exact: padded hidden units compute relu(0) = 0 and
    contribute nothing downstream; padded output columns give tanh(0) = 0 and
    are sliced off in the wrapper."""
    in_dim, h1 = params["w1"].shape
    h2 = params["w2"].shape[1]
    out = params["w3"].shape[1]
    h1p, h2p, outp = (_round_up(d, LANE) for d in (h1, h2, out))

    def pad_w(w, rows, cols):
        r, c = w.shape
        return jnp.pad(w, ((0, rows - r), (0, cols - c))).astype(jnp.bfloat16)

    def pad_b(b, cols):
        return jnp.pad(b, ((0, 0), (0, cols - b.shape[1]))).astype(jnp.float32)

    packed = {
        "w1": pad_w(params["w1"], in_dim, h1p), "b1": pad_b(params["b1"], h1p),
        "w2": pad_w(params["w2"], h1p, h2p),    "b2": pad_b(params["b2"], h2p),
        "w3": pad_w(params["w3"], h2p, outp),   "b3": pad_b(params["b3"], outp),
    }
    return packed, out


def actor_forward(state, packed, out_dim, scale, *, block_b=256):
    """state: (B, input) f32.  packed: output of pack_actor_params."""
    B, in_dim = state.shape
    w1, b1 = packed["w1"], packed["b1"]
    w2, b2 = packed["w2"], packed["b2"]
    w3, b3 = packed["w3"], packed["b3"]
    h1p, h2p, outp = w1.shape[1], w2.shape[1], w3.shape[1]

    # Batch tile: big enough to fill the MXU M dim, rounded to sublane (8).
    tb = min(block_b, _round_up(B, 8))
    Bp = _round_up(B, tb)
    if Bp != B:
        state = jnp.pad(state, ((0, Bp - B), (0, 0)))
    grid = (Bp // tb,)

    kernel = functools.partial(actor_kernel, scale=float(scale))

    weight_bytes = sum(int(np.prod(a.shape)) * a.dtype.itemsize
                       for a in (w1, b1, w2, b2, w3, b3))
    cost = pl.CostEstimate(
        flops=2 * Bp * (in_dim * h1p + h1p * h2p + h2p * outp),
        transcendentals=Bp * outp,
        bytes_accessed=Bp * in_dim * 4 + weight_bytes + Bp * outp * 4,
    )

    out_padded = pl.pallas_call(
        kernel,
        out_shape=jax.ShapeDtypeStruct((Bp, outp), jnp.float32),
        grid=grid,
        in_specs=[
            # State / output: tiled along batch.
            pl.BlockSpec((tb, in_dim), lambda i: (i, 0)),
            # Weights & biases: constant index_map -> loaded once, resident.
            pl.BlockSpec(w1.shape, lambda i: (0, 0)),
            pl.BlockSpec(b1.shape, lambda i: (0, 0)),
            pl.BlockSpec(w2.shape, lambda i: (0, 0)),
            pl.BlockSpec(b2.shape, lambda i: (0, 0)),
            pl.BlockSpec(w3.shape, lambda i: (0, 0)),
            pl.BlockSpec(b3.shape, lambda i: (0, 0)),
        ],
        out_specs=pl.BlockSpec((tb, outp), lambda i: (i, 0)),
        compiler_params=pltpu.CompilerParams(
            dimension_semantics=("parallel",)),
        cost_estimate=cost,
    )(state, w1, b1, w2, b2, w3, b3)

    return out_padded[:B, :out_dim]


def init_actor_params(key, input_dim, hidden1, hidden2, output,
                      init_weight=0.003):
    """Deterministic init matching the PyTorch module's scheme.

    nn_init_weight uses bound = 1/sqrt(size[0]) with size = (out, in), i.e.
    bound = 1/sqrt(out_features) for the first two layers' weights.  Biases
    keep nn.Linear's default uniform(+-1/sqrt(in_features)).  Out-layer
    weight: uniform(+-init_weight).  Weights returned transposed to (in, out).
    """
    ks = jax.random.split(key, 6)

    def u(k, shape, bound):
        return jax.random.uniform(k, shape, jnp.float32, -bound, bound)

    w1 = u(ks[0], (input_dim, hidden1), 1.0 / np.sqrt(hidden1))
    b1 = u(ks[1], (1, hidden1), 1.0 / np.sqrt(input_dim))
    w2 = u(ks[2], (hidden1, hidden2), 1.0 / np.sqrt(hidden2))
    b2 = u(ks[3], (1, hidden2), 1.0 / np.sqrt(hidden1))
    w3 = u(ks[4], (hidden2, output), init_weight)
    b3 = u(ks[5], (1, output), 1.0 / np.sqrt(hidden2))
    return {"w1": w1, "b1": b1, "w2": w2, "b2": b2, "w3": w3, "b3": b3}


def actor_reference(state, params, scale):
    """Pure-JAX f32 reference of the PyTorch forward pass."""
    h1 = jax.nn.relu(state @ params["w1"] + params["b1"])
    h2 = jax.nn.relu(h1 @ params["w2"] + params["b2"])
    return jnp.tanh(h2 @ params["w3"] + params["b3"]) * scale


if __name__ == "__main__":
    # Lane-dense hiddens (128); output=8 is padded to 128 internally.
    batch, input_dim, hidden1, hidden2, output = 512, 32, 128, 128, 8
    scale = 2.0

    key = jax.random.PRNGKey(0)
    k_params, k_state = jax.random.split(key)
    params = init_actor_params(k_params, input_dim, hidden1, hidden2, output)
    state = jax.random.normal(k_state, (batch, input_dim), jnp.float32)

    packed, out_dim = pack_actor_params(params)

    out = actor_forward(state, packed, out_dim, scale, block_b=256)
    out = jax.block_until_ready(out)
    assert out.shape == (batch, output)

    ref = actor_reference(state, params, scale)
    # bf16 matmul operands -> relax tolerance vs the f32 reference.
    np.testing.assert_allclose(np.asarray(out), np.asarray(ref),
                               rtol=2e-2, atol=2e-3)

    print("KERNEL_OK")
</pallas_src>

<mosaic_0001>
module attributes {stable_mosaic.version = 11 : i64} {
  func.func @actor_kernel(%arg0: i32, %arg1: memref<256x32xf32, #tpu.memory_space<vmem>>, %arg2: memref<32x128xbf16, #tpu.memory_space<vmem>>, %arg3: memref<1x128xf32, #tpu.memory_space<vmem>>, %arg4: memref<128x128xbf16, #tpu.memory_space<vmem>>, %arg5: memref<1x128xf32, #tpu.memory_space<vmem>>, %arg6: memref<128x128xbf16, #tpu.memory_space<vmem>>, %arg7: memref<1x128xf32, #tpu.memory_space<vmem>>, %arg8: memref<256x128xf32, #tpu.memory_space<vmem>>) attributes {dimension_semantics = [#tpu.dimension_semantics<parallel>], iteration_bounds = array<i64: 2>, scalar_prefetch = 0 : i64, scratch_operands = 0 : i64, tpu.core_type = #tpu.core_type<tc>, window_params = [{transform_indices = @transform_0, window_bounds = array<i64: 256, 32>}, {pipeline_mode = #tpu.pipeline_mode<synchronous>, transform_indices = @transform_1, window_bounds = array<i64: 32, 128>}, {pipeline_mode = #tpu.pipeline_mode<synchronous>, transform_indices = @transform_2, window_bounds = array<i64: 1, 128>}, {pipeline_mode = #tpu.pipeline_mode<synchronous>, transform_indices = @transform_3, window_bounds = array<i64: 128, 128>}, {pipeline_mode = #tpu.pipeline_mode<synchronous>, transform_indices = @transform_4, window_bounds = array<i64: 1, 128>}, {pipeline_mode = #tpu.pipeline_mode<synchronous>, transform_indices = @transform_5, window_bounds = array<i64: 128, 128>}, {pipeline_mode = #tpu.pipeline_mode<synchronous>, transform_indices = @transform_6, window_bounds = array<i64: 1, 128>}, {transform_indices = @transform_7, window_bounds = array<i64: 256, 128>}]} {
    %c0 = arith.constant 0 : index
    %c0_0 = arith.constant 0 : index
    %0 = vector.load %arg1[%c0, %c0_0] : memref<256x32xf32, #tpu.memory_space<vmem>>, vector<256x32xf32>
    %1 = arith.truncf %0 : vector<256x32xf32> to vector<256x32xbf16>
    %c0_1 = arith.constant 0 : index
    %c0_2 = arith.constant 0 : index
    %2 = vector.load %arg2[%c0_1, %c0_2] : memref<32x128xbf16, #tpu.memory_space<vmem>>, vector<32x128xbf16>
    %cst = arith.constant dense<0.000000e+00> : vector<256x128xf32>
    %3 = tpu.matmul %1, %2, %cst {dimension_numbers = #tpu.dot_dimension_numbers<[1], [0], [0], [1], [0, 0, 1, 1], [], []>} : vector<256x32xbf16>, vector<32x128xbf16>, vector<256x128xf32> -> vector<256x128xf32>
    %c0_3 = arith.constant 0 : index
    %c0_4 = arith.constant 0 : index
    %4 = vector.load %arg3[%c0_3, %c0_4] : memref<1x128xf32, #tpu.memory_space<vmem>>, vector<1x128xf32>
    %5 = vector.broadcast %4 : vector<1x128xf32> to vector<256x128xf32>
    %6 = arith.addf %3, %5 : vector<256x128xf32>
    %cst_5 = arith.constant 0.000000e+00 : f32
    %7 = vector.broadcast %cst_5 : f32 to vector<256x128xf32>
    %8 = arith.maximumf %6, %7 : vector<256x128xf32>
    %9 = arith.truncf %8 : vector<256x128xf32> to vector<256x128xbf16>
    %c0_6 = arith.constant 0 : index
    %c0_7 = arith.constant 0 : index
    %10 = vector.load %arg4[%c0_6, %c0_7] : memref<128x128xbf16, #tpu.memory_space<vmem>>, vector<128x128xbf16>
    %cst_8 = arith.constant dense<0.000000e+00> : vector<256x128xf32>
    %11 = tpu.matmul %9, %10, %cst_8 {dimension_numbers = #tpu.dot_dimension_numbers<[1], [0], [0], [1], [0, 0, 1, 1], [], []>} : vector<256x128xbf16>, vector<128x128xbf16>, vector<256x128xf32> -> vector<256x128xf32>
    %c0_9 = arith.constant 0 : index
    %c0_10 = arith.constant 0 : index
    %12 = vector.load %arg5[%c0_9, %c0_10] : memref<1x128xf32, #tpu.memory_space<vmem>>, vector<1x128xf32>
    %13 = vector.broadcast %12 : vector<1x128xf32> to vector<256x128xf32>
    %14 = arith.addf %11, %13 : vector<256x128xf32>
    %cst_11 = arith.constant 0.000000e+00 : f32
    %15 = vector.broadcast %cst_11 : f32 to vector<256x128xf32>
    %16 = arith.maximumf %14, %15 : vector<256x128xf32>
    %17 = arith.truncf %16 : vector<256x128xf32> to vector<256x128xbf16>
    %c0_12 = arith.constant 0 : index
    %c0_13 = arith.constant 0 : index
    %18 = vector.load %arg6[%c0_12, %c0_13] : memref<128x128xbf16, #tpu.memory_space<vmem>>, vector<128x128xbf16>
    %cst_14 = arith.constant dense<0.000000e+00> : vector<256x128xf32>
    %19 = tpu.matmul %17, %18, %cst_14 {dimension_numbers = #tpu.dot_dimension_numbers<[1], [0], [0], [1], [0, 0, 1, 1], [], []>} : vector<256x128xbf16>, vector<128x128xbf16>, vector<256x128xf32> -> vector<256x128xf32>
    %c0_15 = arith.constant 0 : index
    %c0_16 = arith.constant 0 : index
    %20 = vector.load %arg7[%c0_15, %c0_16] : memref<1x128xf32, #tpu.memory_space<vmem>>, vector<1x128xf32>
    %21 = vector.broadcast %20 : vector<1x128xf32> to vector<256x128xf32>
    %22 = arith.addf %19, %21 : vector<256x128xf32>
    %23 = math.tanh %22 : vector<256x128xf32>
    %cst_17 = arith.constant 2.000000e+00 : f32
    %24 = vector.broadcast %cst_17 : f32 to vector<256x128xf32>
    %25 = arith.mulf %23, %24 : vector<256x128xf32>
    %c0_18 = arith.constant 0 : index
    %c0_19 = arith.constant 0 : index
    %26 = vector.load %arg8[%c0_18, %c0_19] : memref<256x128xf32, #tpu.memory_space<vmem>>, vector<256x128xf32>
    tpu.vector_store %arg8[%c0_18, %c0_19], %25 {strides = array<i32>} : memref<256x128xf32, #tpu.memory_space<vmem>>, vector<256x128xf32>,
    return
  }
  func.func @transform_0(%arg0: i32) -> (i32, i32) {
    %c0_i32 = arith.constant 0 : i32
    %c0_i32_0 = arith.constant 0 : i32
    return %arg0, %c0_i32 : i32, i32
  }
  func.func @transform_1(%arg0: i32) -> (i32, i32) {
    %c0_i32 = arith.constant 0 : i32
    %c0_i32_0 = arith.constant 0 : i32
    %c0_i32_1 = arith.constant 0 : i32
    return %c0_i32, %c0_i32_0 : i32, i32
  }
  func.func @transform_2(%arg0: i32) -> (i32, i32) {
    %c0_i32 = arith.constant 0 : i32
    %c0_i32_0 = arith.constant 0 : i32
    %c0_i32_1 = arith.constant 0 : i32
    return %c0_i32, %c0_i32_0 : i32, i32
  }
  func.func @transform_3(%arg0: i32) -> (i32, i32) {
    %c0_i32 = arith.constant 0 : i32
    %c0_i32_0 = arith.constant 0 : i32
    %c0_i32_1 = arith.constant 0 : i32
    return %c0_i32, %c0_i32_0 : i32, i32
  }
  func.func @transform_4(%arg0: i32) -> (i32, i32) {
    %c0_i32 = arith.constant 0 : i32
    %c0_i32_0 = arith.constant 0 : i32
    %c0_i32_1 = arith.constant 0 : i32
    return %c0_i32, %c0_i32_0 : i32, i32
  }
  func.func @transform_5(%arg0: i32) -> (i32, i32) {
    %c0_i32 = arith.constant 0 : i32
    %c0_i32_0 = arith.constant 0 : i32
    %c0_i32_1 = arith.constant 0 : i32
    return %c0_i32, %c0_i32_0 : i32, i32
  }
  func.func @transform_6(%arg0: i32) -> (i32, i32) {
    %c0_i32 = arith.constant 0 : i32
    %c0_i32_0 = arith.constant 0 : i32
    %c0_i32_1 = arith.constant 0 : i32
    return %c0_i32, %c0_i32_0 : i32, i32
  }
  func.func @transform_7(%arg0: i32) -> (i32, i32) {
    %c0_i32 = arith.constant 0 : i32
    %c0_i32_0 = arith.constant 0 : i32
    return %arg0, %c0_i32 : i32, i32
  }
}

</mosaic_0001>

<bundles_post_ra>
// kernel: tpu_custom_call.1
= control target key start
LH: loop header
LB: loop body
LE: loop exit
PB: predicated region body
PF: predicated region fallthrough
CT: control target
= control target key end

     0   :  { %12 = vsyncpa [#allocation3], 0  ;;  %s2144_s0 = inlined_call_operand.vmem [shape: f32[512,32], index: 0, kind: input, shape index: {}]   ;;  %s2145_s1 = inlined_call_operand.vmem [shape: bf16[32,128], index: 1, kind: input, shape index: {}]   ;;  %s2146_s2 = inlined_call_operand.vmem [shape: f32[1,128], index: 2, kind: input, shape index: {}]   ;;  %s2147_s3 = inlined_call_operand.vmem [shape: bf16[128,128], index: 3, kind: input, shape index: {}]   ;;  %s2148_s4 = inlined_call_operand.vmem [shape: f32[1,128], index: 4, kind: input, shape index: {}]   ;;  %s2149_s5 = inlined_call_operand.vmem [shape: bf16[128,128], index: 5, kind: input, shape index: {}]   ;;  %s2150_s6 = inlined_call_operand.vmem [shape: f32[1,128], index: 6, kind: input, shape index: {}]   ;;  %s2151_s7 = inlined_call_operand.hbm [shape: f32[512,128], index: 7, kind: output, shape index: {}]  }
   0x1   :  { %14 = vsyncpa [#allocation3 + $0x1], 0  ;;  %s1774_s24 = smov 0   ;;  %s1776_s25 = smov 0  }
   0x2   :  { %s1778_s26 = smov 0   ;;  %s1780_s27 = smov 0  }
   0x3 LB: > { %s1795_s28 = sadd.s32 4294967295, %s1729_s27   ;;  %s1294_s29 = sadd.s32 4294967294, %s1729_s27   ;;  %s1729_s27 = sphi %s1780_s27, %s2157_s27   ;;  %s1725_s26 = sphi %s1778_s26, %s2156_s26   ;;  %s1721_s25 = sphi %s1776_s25, %s2155_s25   ;;  %s1717_s24 = sphi %s1774_s24, %s2154_s24  }
   0x4   : > { %s1799_s30 = sadd.s32 1, %s1729_s27   ;;  %s179_s8 = sadd.s32 1, %s1725_s26 }
   0x5   : > { %s176_s9 = ssub.s32 %s1729_s27, %s1799_s30  ;;  %p189_p0 = scmp.ne.s32.totalorder %s1725_s26, %s1721_s25 }
   0x6   : > { %p177_p1 = scmp.eq.s32.totalorder %s176_s9, 0  ;;  %p190_p2 = scmp.eq.s32.totalorder %s1795_s28, 1 }
   0x7   : > { %p195_p3 = scmp.ne.s32.totalorder %s1721_s25, %s1717_s24  ;;  %p196_p4 = scmp.eq.s32.totalorder %s1294_s29, 1 }
   0x8   : > { %s1810_s10 = scalar_select %p177_p1, %s1725_s26, %s179_s8  }
   0x9   : > { %p1812_p5 = por %p190_p2, %p189_p0  ;;  %p1816_p6 = por %p196_p4, %p195_p3 }
   0xa   : > { %p1297_p7 = scmp.ge.s32.totalorder %s1729_s27, 1  ;;  %p241_p8 = scmp.lt.s32.totalorder %s1729_s27, 3 }
   0xc   : > { %p242_p9 = pnand %p1297_p7, %p241_p8 }
   0xd   : > { %s1299_s15 = sshll.u32 (!%p242_p9), %s1795_s28, 5  ;;  %s270_s18 = sand.u32 (!%p242_p9), 1, %s1721_s25  }
   0xe   : > { %245 = sbr.rel (%p242_p9) target bundleno = 727 (0x2d7), region = 48  ;;  %p274_p10 = scmp.lt.s32.totalorder (!%p242_p9), %s1299_s15, 63 }
   0xf   : > { %s1298_s19 = sshll.u32 (!%p242_p9), %s270_s18, 8  ;;  %s1343_s21 = sshll.u32 (!%p242_p9), %s1795_s28, 12 }
  0x10   : > { %s2096_s8 = scalar_lea.hbm (!%p242_p9), %s2151_s7, %s1343_s21  ;;  %s2104_s28 = scalar_lea.sflag (!%p242_p9), [#allocation3], %s270_s18 }
  0x11   : > { %s1731_s13 = smov (!%p242_p9), [#allocation2]  }
  0x12   : > { %s1673_s14 = sshll.u32 (!%p242_p9), %s1731_s13, 4  ;;  %s1674_s14 = int_to_ptr.vmem [resolvable:$false] %s1673_s14 }
  0x13   : > { %v1587_v0 = vld [vmem:[%s2145_s1 + $0x8] sm:$0xff]   ;;  %v1588_v1 = vld [vmem:[%s2145_s1] sm:$0xff]   ;;  %s2159_s15 = smov (!%p274_p10, %s1299_s15), 63  ;;  %v1589_v2 = vld [vmem:[%s2147_s3 + $0x38] sm:$0xff]   ;;  %vm352_vm0 = vcmask 261120  }
  0x14   : > { %1410 = vmatprep.subr.bf16.mxu0 %v1587_v0  ;;  %1542 = vmatprep.subr.bf16.mxu1 %v1587_v0  ;;  %s1300_s20 = sshll.u32 %s2159_s15, 3  ;;  %v1590_v24 = vld [vmem:[%s2147_s3 + $0x30] sm:$0xff]   ;;  %v1591_v30 = vld [vmem:[%s2147_s3 + $0x28] sm:$0xff]   ;;  %v1592_v38 = vld [vmem:[%s2147_s3 + $0x20] sm:$0xff]   ;;  %s1675_s15 = scalar_lea.vmem %s1674_s14, 8192 }
  0x15   : > { %1411 = vmatpush3.bf16.msra.mxu0 %v1587_v0  ;;  %1544 = vmatpush3.bf16.msra.mxu1 %v1587_v0  ;;  %s1835_s23 = scalar_lea.vmem %s2144_s0, %s1300_s20  ;;  %v1593_v46 = vld [vmem:[%s2147_s3 + $0x18] sm:$0xff]   ;;  %v1594_v55 = vld [vmem:[%s2147_s3 + $0x10] sm:$0xff]   ;;  %v1595_v56 = vld [vmem:[%s2147_s3 + $0x8] sm:$0xff]   ;;  %s2036_s20 = scalar_lea.vmem [#allocation2], %s1298_s19 }
  0x16   : > { %1412 = vmatprep.subr.bf16.mxu0 %v1588_v1  ;;  %1543 = vmatprep.subr.bf16.mxu1 %v1588_v1  ;;  %v281_v3 = vld [vmem:[%s1835_s23] sm:$0xff]  ;;  %v282_v4 = vld [vmem:[%s1835_s23 + $0x8] sm:$0xff]  ;;  %v283_v5 = vld [vmem:[%s1835_s23 + $0x10] sm:$0xff]  ;;  %s1232_s22 = sshll.u32 %s2036_s20, 4  ;;  %s2098_s22 = int_to_ptr.vmem [resolvable:$true] %s1232_s22 }
  0x17   : > { %v313_v6 = vpack.c.bf16 %v282_v4, %v281_v3  ;;  %v284_v7 = vld [vmem:[%s1835_s23 + $0x18] sm:$0xff]  ;;  %v285_v8 = vld [vmem:[%s1835_s23 + $0x20] sm:$0xff]  ;;  %v286_v9 = vld [vmem:[%s1835_s23 + $0x28] sm:$0xff]  ;;  %s1669_s9 = scalar_lea.vmem %s2098_s22, 4096  ;;  %p1676_p0 = scmp.lt.s32.totalorder %s2098_s22, %s1674_s14 }
  0x18   : > { %v314_v10 = vpack.c.bf16 %v284_v7, %v283_v5  ;;  %v315_v11 = vpack.c.bf16 %v286_v9, %v285_v8  ;;  %v287_v12 = vld [vmem:[%s1835_s23 + $0x30] sm:$0xff]  ;;  %v288_v13 = vld [vmem:[%s1835_s23 + $0x38] sm:$0xff]  ;;  %v289_v14 = vld [vmem:[%s1835_s23 + $0x40] sm:$0xff]  ;;  %p1670_p11 = scmp.ne.s32.totalorder %s2098_s22, %s1669_s9  ;;  %p1677_p1 = scmp.lt.s32.totalorder %s1675_s15, %s1669_s9 }
  0x19   : > { %1413 = vmatpush3.bf16.msra.mxu0 %v1588_v1  ;;  %1545 = vmatpush3.bf16.msra.mxu1 %v1588_v1  ;;  %v290_v15 = vld [vmem:[%s1835_s23 + $0x48] sm:$0xff]  ;;  %v297_v16 = vld [vmem:[%s1835_s23 + $0x80] sm:$0xff]  ;;  %v299_v19 = vld [vmem:[%s1835_s23 + $0x90] sm:$0xff]  ;;  %v316_v25 = vpack.c.bf16 %v288_v13, %v287_v12 }
  0x1a   : > { %1446 = vmatprep.subr.bf16.mxu1 %v1589_v2  ;;  %1414 = vmatprep.mubr.msk.bf16.mxu0 %vm352_vm0, %v313_v6  ;;  %v298_v17 = vld [vmem:[%s1835_s23 + $0x88] sm:$0xff]  ;;  %v300_v20 = vld [vmem:[%s1835_s23 + $0x98] sm:$0xff]  ;;  %v301_v21 = vld [vmem:[%s1835_s23 + $0xa0] sm:$0xff]  ;;  %v317_v27 = vpack.c.bf16 %v290_v15, %v289_v14  ;;  %p1671_p12 = pnand %p1670_p11, %p1812_p5  ;;  %p1678_p2 = por %p1677_p1, %p1676_p0 }
  0x1b   : > { %v321_v18 = vpack.c.bf16 %v298_v17, %v297_v16  ;;  %v322_v22 = vpack.c.bf16 %v300_v20, %v299_v19  ;;  %v302_v23 = vld [vmem:[%s1835_s23 + $0xa8] sm:$0xff]  ;;  %v303_v28 = vld [vmem:[%s1835_s23 + $0xb0] sm:$0xff]  ;;  %v304_v29 = vld [vmem:[%s1835_s23 + $0xb8] sm:$0xff] }
  0x1c   : > { %1415 = vmatmul.mubr.msk.bf16.vlgmr.msra.gmra.mxu0 %vm352_vm0, %v314_v10  ;;  %v323_v26 = vpack.c.bf16 %v302_v23, %v301_v21  ;;  %v305_v31 = vld [vmem:[%s1835_s23 + $0xc0] sm:$0xff]  ;;  %v306_v32 = vld [vmem:[%s1835_s23 + $0xc8] sm:$0xff]  ;;  %v291_v33 = vld [vmem:[%s1835_s23 + $0x50] sm:$0xff]  ;;  %v324_v37 = vpack.c.bf16 %v304_v29, %v303_v28  ;;  %p1672_p13 = pneg %p1671_p12 }
  0x1d   : > { %1418 = vmatprep.mubr.msk.bf16.mxu0 %vm352_vm0, %v315_v11  ;;  %1430 = vmatprep.mubr.msk.bf16.mxu1 %vm352_vm0, %v321_v18  ;;  %v292_v34 = vld [vmem:[%s1835_s23 + $0x58] sm:$0xff]  ;;  %v293_v35 = vld [vmem:[%s1835_s23 + $0x60] sm:$0xff]  ;;  %v294_v36 = vld [vmem:[%s1835_s23 + $0x68] sm:$0xff]  ;;  %v325_v39 = vpack.c.bf16 %v306_v32, %v305_v31 }
  0x1e   : > { %1431 = vmatmul.mubr.msk.bf16.vlgmr.msra.gmra.mxu1 %vm352_vm0, %v322_v22  ;;  %v318_v40 = vpack.c.bf16 %v292_v34, %v291_v33  ;;  %v319_v41 = vpack.c.bf16 %v294_v36, %v293_v35  ;;  %v307_v42 = vld [vmem:[%s1835_s23 + $0xd0] sm:$0xff]  ;;  %v308_v43 = vld [vmem:[%s1835_s23 + $0xd8] sm:$0xff]  ;;  %v309_v44 = vld [vmem:[%s1835_s23 + $0xe0] sm:$0xff]  ;;  %p1679_p3 = pnand %p1678_p2, %p1672_p13 }
  0x1f   : > { %1434 = vmatprep.mubr.msk.bf16.mxu1 %vm352_vm0, %v323_v26  ;;  %1447 = vmatpush3.bf16.msra.mxu1 %v1589_v2  ;;  %v310_v45 = vld [vmem:[%s1835_s23 + $0xe8] sm:$0xff]  ;;  %v295_v47 = vld [vmem:[%s1835_s23 + $0x70] sm:$0xff]  ;;  %v296_v48 = vld [vmem:[%s1835_s23 + $0x78] sm:$0xff]  ;;  %v326_v49 = vpack.c.bf16 %v308_v43, %v307_v42 }
  0x20   : > { %1448 = vmatprep.subr.bf16.mxu1 %v1590_v24  ;;  %v327_v50 = vpack.c.bf16 %v310_v45, %v309_v44  ;;  %v320_v51 = vpack.c.bf16 %v296_v48, %v295_v47  ;;  %v311_v52 = vld [vmem:[%s1835_s23 + $0xf0] sm:$0xff]  ;;  %v312_v53 = vld [vmem:[%s1835_s23 + $0xf8] sm:$0xff]  ;;  %v1596_v57 = vld [vmem:[%s2147_s3] sm:$0xff]  }
  0x21   : > { %v328_v54 = vpack.c.bf16 %v312_v53, %v311_v52  ;;  %v1597_v58 = vld [vmem:[%s2149_s5 + $0x38] sm:$0xff]   ;;  %v1598_v59 = vld [vmem:[%s2149_s5 + $0x30] sm:$0xff]   ;;  %v1599_v60 = vld [vmem:[%s2149_s5 + $0x28] sm:$0xff]  }
  0x22   : > { %1494 = vmatprep.subr.bf16.mxu0 %v1597_v58  ;;  %v1600_v61 = vld [vmem:[%s2149_s5 + $0x20] sm:$0xff]   ;;  %v1601_v62 = vld [vmem:[%s2149_s5 + $0x18] sm:$0xff]  }
  0x23   : > { %1449 = vmatpush3.bf16.msra.mxu1 %v1590_v24  ;;  %1495 = vmatpush3.bf16.msra.mxu0 %v1597_v58  ;;  %v1924_v1 = vld [vmem:[%s2146_s2] ss:$0 sm:$0xff] }
  0x24   : > { %1419 = vmatmul.mubr.msk.bf16.gmra.mxu0 %vm352_vm0, %v316_v25  ;;  %1450 = vmatprep.subr.bf16.mxu1 %v1591_v30 }
  0x25   : > { %1422 = vmatprep.mubr.msk.bf16.mxu0 %vm352_vm0, %v317_v27  ;;  %1496 = vmatprep.subr.bf16.mxu0 %v1598_v59 }
  0x26   : > { %1435 = vmatmul.mubr.msk.bf16.gmra.mxu1 %vm352_vm0, %v324_v37 }
  0x27   : > { %1438 = vmatprep.mubr.msk.bf16.mxu1 %vm352_vm0, %v325_v39  ;;  %1451 = vmatpush3.bf16.msra.mxu1 %v1591_v30 }
  0x28   : > { %1452 = vmatprep.subr.bf16.mxu1 %v1592_v38  ;;  %1497 = vmatpush3.bf16.msra.mxu0 %v1598_v59 }
  0x29   : > { %1498 = vmatprep.subr.bf16.mxu0 %v1599_v60 }
  0x2b   : > { %1453 = vmatpush3.bf16.msra.mxu1 %v1592_v38 }
  0x2c   : > { %1423 = vmatmul.mubr.msk.bf16.gmra.mxu0 %vm352_vm0, %v318_v40  ;;  %1454 = vmatprep.subr.bf16.mxu1 %v1593_v46 }
  0x2d   : > { %1426 = vmatprep.mubr.msk.bf16.mxu0 %vm352_vm0, %v319_v41  ;;  %1499 = vmatpush3.bf16.msra.mxu0 %v1599_v60 }
  0x2e   : > { %1439 = vmatmul.mubr.msk.bf16.gmra.mxu1 %vm352_vm0, %v326_v49  ;;  %1500 = vmatprep.subr.bf16.mxu0 %v1600_v61 }
  0x2f   : > { %1442 = vmatprep.mubr.msk.bf16.mxu1 %vm352_vm0, %v327_v50  ;;  %1455 = vmatpush3.bf16.msra.mxu1 %v1593_v46 }
  0x30   : > { %1456 = vmatprep.subr.bf16.mxu1 %v1594_v55 }
  0x31   : > { %1501 = vmatpush3.bf16.msra.mxu0 %v1600_v61 }
  0x32   : > { %1502 = vmatprep.subr.bf16.mxu0 %v1601_v62 }
  0x33   : > { %1457 = vmatpush3.bf16.msra.mxu1 %v1594_v55 }
  0x34   : > { %1427 = vmatmul.mubr.msk.bf16.gmra.mxu0 %vm352_vm0, %v320_v51  ;;  %1458 = vmatprep.subr.bf16.mxu1 %v1595_v56 }
  0x35   : > { %1503 = vmatpush3.bf16.msra.mxu0 %v1601_v62 }
  0x36   : > { %1443 = vmatmul.mubr.msk.bf16.gmra.mxu1 %vm352_vm0, %v328_v54 }
  0x37   : > { %1459 = vmatpush3.bf16.msra.mxu1 %v1595_v56 }
  0x38   : > { %1460 = vmatprep.subr.bf16.mxu1 %v1596_v57 }
  0x3b   : > { %1461 = vmatpush3.bf16.msra.mxu1 %v1596_v57 }
  0xdc   : > { %v1416_v63 = vpop.f32.mrf.mxu0 }
  0xdd   : > { %v444_v6 = vadd.f32 %v1416_v63, %v1924_v1 }
  0xde   : > { %v435_v0 = vpop.f32.mrf.mxu0  ;;  %v1928_v5 = vpop.f32.mrf.mxu1 }
  0xdf   : > { %v436_v3 = vadd.f32 %v1924_v1, %v435_v0  ;;  %v564_v15 = vmax.f32 %v444_v6, 0.0 }
  0xe0   : > { %v1417_v2 = vpop.f32.mrf.mxu0  ;;  %v499_v9 = vpop.f32.mrf.mxu1 }
  0xe1   : > { %v447_v4 = vadd.f32 %v1417_v2, %v1924_v1  ;;  %v562_v12 = vmax.f32 %v436_v3, 0.0  ;;  %v500_v53 = vadd.f32 %v1924_v1, %v499_v9 }
  0xe2   : > { %v438_v7 = vpop.f32.mrf.mxu0  ;;  %v1932_v14 = vpop.f32.mrf.mxu1 }
  0xe3   : > { %v439_v8 = vadd.f32 %v1924_v1, %v438_v7  ;;  %v565_v10 = vmax.f32 %v447_v4, 0.0  ;;  %v578_v62 = vmax.f32 %v500_v53, 0.0  ;;  %v1985_v53 = vld [vmem:[%s2148_s4] ss:$0 sm:$0xff] }
  0xe4   : > { %v1420_v11 = vpop.f32.mrf.mxu0  ;;  %v502_v18 = vpop.f32.mrf.mxu1 }
  0xe5   : > { %v563_v13 = vmax.f32 %v439_v8, 0.0  ;;  %v595_v19 = vpack.c.bf16 %v565_v10, %v564_v15  ;;  %v460_v24 = vadd.f32 %v1420_v11, %v1924_v1  ;;  %v503_v54 = vadd.f32 %v1924_v1, %v502_v18 }
  0xe6   : > { %v451_v16 = vpop.f32.mrf.mxu0  ;;  %v1936_v23 = vpop.f32.mrf.mxu1  ;;  %v511_v15 = vadd.f32 %v1932_v14, %v1924_v1 }
  0xe7   : > { %v594_v17 = vpack.c.bf16 %v563_v13, %v562_v12  ;;  %v452_v21 = vadd.f32 %v1924_v1, %v451_v16  ;;  %v568_v33 = vmax.f32 %v460_v24, 0.0  ;;  %v579_v0 = vmax.f32 %v503_v54, 0.0 }
  0xe8   : > { %v1421_v20 = vpop.f32.mrf.mxu0  ;;  %v515_v27 = vpop.f32.mrf.mxu1  ;;  %v508_v12 = vadd.f32 %v1928_v5, %v1924_v1  ;;  %v524_v5 = vadd.f32 %v1936_v23, %v1924_v1 }
  0xe9   : > { %v463_v22 = vadd.f32 %v1421_v20, %v1924_v1  ;;  %1462 = vmatprep.mubr.bf16.mxu1 %v594_v17  ;;  %v566_v30 = vmax.f32 %v452_v21, 0.0  ;;  %v602_v9 = vpack.c.bf16 %v579_v0, %v578_v62  ;;  %v516_v10 = vadd.f32 %v1924_v1, %v515_v27 }
  0xea   : > { %v454_v25 = vpop.f32.mrf.mxu0  ;;  %1463 = vmatmul.mubr.bf16.vlgmr.msra.gmra.mxu1 %v595_v19  ;;  %v1940_v32 = vpop.f32.mrf.mxu1  ;;  %v580_v19 = vmax.f32 %v508_v12, 0.0  ;;  %v581_v20 = vmax.f32 %v511_v15, 0.0 }
  0xeb   : > { %v455_v26 = vadd.f32 %v1924_v1, %v454_v25  ;;  %v569_v28 = vmax.f32 %v463_v22, 0.0  ;;  %v582_v17 = vmax.f32 %v516_v10, 0.0  ;;  %v527_v14 = vadd.f32 %v1940_v32, %v1924_v1 }
  0xec   : > { %v1424_v29 = vpop.f32.mrf.mxu0  ;;  %v518_v36 = vpop.f32.mrf.mxu1 }
  0xed   : > { %v567_v31 = vmax.f32 %v455_v26, 0.0  ;;  %v597_v37 = vpack.c.bf16 %v569_v28, %v568_v33  ;;  %v476_v42 = vadd.f32 %v1424_v29, %v1924_v1  ;;  %v519_v11 = vadd.f32 %v1924_v1, %v518_v36 }
  0xee   : > { %v467_v34 = vpop.f32.mrf.mxu0  ;;  %v1944_v41 = vpop.f32.mrf.mxu1  ;;  %v603_v26 = vpack.c.bf16 %v581_v20, %v580_v19 }
  0xef   : > { %v596_v35 = vpack.c.bf16 %v567_v31, %v566_v30  ;;  %v468_v39 = vadd.f32 %v1924_v1, %v467_v34  ;;  %v572_v50 = vmax.f32 %v476_v42, 0.0  ;;  %v583_v18 = vmax.f32 %v519_v11, 0.0 }
  0xf0   : > { %v1425_v38 = vpop.f32.mrf.mxu0  ;;  %v531_v47 = vpop.f32.mrf.mxu1  ;;  %v584_v30 = vmax.f32 %v524_v5, 0.0  ;;  %v585_v31 = vmax.f32 %v527_v14, 0.0  ;;  %v540_v23 = vadd.f32 %v1944_v41, %v1924_v1  ;;  %v1602_v41 = vld [vmem:[%s2149_s5 + $0x10] sm:$0xff]  }
  0xf1   : > { %v479_v40 = vadd.f32 %v1425_v38, %v1924_v1  ;;  %1466 = vmatprep.mubr.bf16.mxu1 %v596_v35  ;;  %v570_v48 = vmax.f32 %v468_v39, 0.0  ;;  %v604_v22 = vpack.c.bf16 %v583_v18, %v582_v17  ;;  %v532_v24 = vadd.f32 %v1924_v1, %v531_v47  ;;  %1504 = vmatprep.subr.bf16.mxu0 %v1602_v41 }
  0xf2   : > { %v470_v43 = vpop.f32.mrf.mxu0  ;;  %1467 = vmatmul.mubr.bf16.gmra.mxu1 %v597_v37  ;;  %v1441_v57 = vpop.f32.mrf.mxu1  ;;  %v605_v37 = vpack.c.bf16 %v585_v31, %v584_v30  ;;  %1505 = vmatpush3.bf16.msra.mxu0 %v1602_v41 }
  0xf3   : > { %v471_v44 = vadd.f32 %v1924_v1, %v470_v43  ;;  %v573_v45 = vmax.f32 %v479_v40, 0.0  ;;  %v586_v28 = vmax.f32 %v532_v24, 0.0  ;;  %v543_v38 = vadd.f32 %v1441_v57, %v1924_v1 }
  0xf4   : > { %v1428_v46 = vpop.f32.mrf.mxu0  ;;  %v534_v3 = vpop.f32.mrf.mxu1  ;;  %v588_v40 = vmax.f32 %v540_v23, 0.0 }
  0xf5   : > { %v571_v49 = vmax.f32 %v471_v44, 0.0  ;;  %v599_v55 = vpack.c.bf16 %v573_v45, %v572_v50  ;;  %v492_v60 = vadd.f32 %v1428_v46, %v1924_v1  ;;  %v535_v25 = vadd.f32 %v1924_v1, %v534_v3  ;;  %v1603_v50 = vld [vmem:[%s2149_s5 + $0x8] sm:$0xff]  }
  0xf6   : > { %v483_v51 = vpop.f32.mrf.mxu0  ;;  %v1444_v16 = vpop.f32.mrf.mxu1  ;;  %v589_v42 = vmax.f32 %v543_v38, 0.0  ;;  %1506 = vmatprep.subr.bf16.mxu0 %v1603_v50 }
  0xf7   : > { %v598_v52 = vpack.c.bf16 %v571_v49, %v570_v48  ;;  %v484_v58 = vadd.f32 %v1924_v1, %v483_v51  ;;  %v576_v7 = vmax.f32 %v492_v60, 0.0  ;;  %v587_v29 = vmax.f32 %v535_v25, 0.0  ;;  %1507 = vmatpush3.bf16.msra.mxu0 %v1603_v50 }
  0xf8   : > { %v1429_v56 = vpop.f32.mrf.mxu0  ;;  %v547_v21 = vpop.f32.mrf.mxu1  ;;  %v607_v44 = vpack.c.bf16 %v589_v42, %v588_v40  ;;  %v556_v45 = vadd.f32 %v1444_v16, %v1924_v1 }
  0xf9   : > { %v495_v59 = vadd.f32 %v1429_v56, %v1924_v1  ;;  %1470 = vmatprep.mubr.bf16.mxu1 %v598_v52  ;;  %v574_v4 = vmax.f32 %v484_v58, 0.0  ;;  %v606_v34 = vpack.c.bf16 %v587_v29, %v586_v28  ;;  %v548_v35 = vadd.f32 %v1924_v1, %v547_v21 }
  0xfa   : > { %v486_v61 = vpop.f32.mrf.mxu0  ;;  %1471 = vmatmul.mubr.bf16.gmra.mxu1 %v599_v55  ;;  %v1445_v27 = vpop.f32.mrf.mxu1  ;;  %v592_v47 = vmax.f32 %v556_v45, 0.0 }
  0xfb   : > { %v487_v63 = vadd.f32 %v1924_v1, %v486_v61  ;;  %v577_v2 = vmax.f32 %v495_v59, 0.0  ;;  %v590_v32 = vmax.f32 %v548_v35, 0.0  ;;  %v559_v46 = vadd.f32 %v1445_v27, %v1924_v1 }
  0xfc   : > { %v550_v33 = vpop.f32.mrf.mxu1 }
  0xfd   : > { %v575_v6 = vmax.f32 %v487_v63, 0.0  ;;  %v601_v13 = vpack.c.bf16 %v577_v2, %v576_v7  ;;  %v551_v36 = vadd.f32 %v1924_v1, %v550_v33  ;;  %v593_v48 = vmax.f32 %v559_v46, 0.0  ;;  %v1604_v1 = vld [vmem:[%s2149_s5] sm:$0xff]  }
  0xfe   : > { %1508 = vmatprep.subr.bf16.mxu0 %v1604_v1 }
  0xff   : > { %v600_v8 = vpack.c.bf16 %v575_v6, %v574_v4  ;;  %v591_v39 = vmax.f32 %v551_v36, 0.0  ;;  %v609_v49 = vpack.c.bf16 %v593_v48, %v592_v47  ;;  %1509 = vmatpush3.bf16.msra.mxu0 %v1604_v1 }
 0x101   : > { %1474 = vmatprep.mubr.bf16.mxu1 %v600_v8  ;;  %v608_v43 = vpack.c.bf16 %v591_v39, %v590_v32 }
 0x102   : > { %1475 = vmatmul.mubr.bf16.gmra.mxu1 %v601_v13 }
 0x103   : > { %1478 = vmatprep.mubr.bf16.mxu1 %v602_v9 }
 0x10a   : > { %1479 = vmatmul.mubr.bf16.gmra.mxu1 %v603_v26 }
 0x10b   : > { %1482 = vmatprep.mubr.bf16.mxu1 %v604_v22 }
 0x112   : > { %1483 = vmatmul.mubr.bf16.gmra.mxu1 %v605_v37 }
 0x113   : > { %1486 = vmatprep.mubr.bf16.mxu1 %v606_v34 }
 0x11a   : > { %1487 = vmatmul.mubr.bf16.gmra.mxu1 %v607_v44 }
 0x11b   : > { %1490 = vmatprep.mubr.bf16.mxu1 %v608_v43 }
 0x122   : > { %1491 = vmatmul.mubr.bf16.gmra.mxu1 %v609_v49 }
 0x1aa   : > { %v1464_v51 = vpop.f32.mrf.mxu1 }
 0x1ab   : > { %v724_v57 = vadd.f32 %v1464_v51, %v1985_v53 }
 0x1ac   : > { %v715_v52 = vpop.f32.mrf.mxu1 }
 0x1ad   : > { %v716_v55 = vadd.f32 %v1985_v53, %v715_v52  ;;  %v844_v0 = vmax.f32 %v724_v57, 0.0 }
 0x1ae   : > { %v1465_v54 = vpop.f32.mrf.mxu1 }
 0x1af   : > { %v727_v56 = vadd.f32 %v1465_v54, %v1985_v53  ;;  %v842_v62 = vmax.f32 %v716_v55, 0.0 }
 0x1b0   : > { %v718_v58 = vpop.f32.mrf.mxu1 }
 0x1b1   : > { %v719_v59 = vadd.f32 %v1985_v53, %v718_v58  ;;  %v845_v60 = vmax.f32 %v727_v56, 0.0 }
 0x1b2   : > { %v1468_v61 = vpop.f32.mrf.mxu1 }
 0x1b3   : > { %v843_v63 = vmax.f32 %v719_v59, 0.0  ;;  %v875_v4 = vpack.c.bf16 %v845_v60, %v844_v0  ;;  %v740_v9 = vadd.f32 %v1468_v61, %v1985_v53 }
 0x1b4   : > { %v731_v2 = vpop.f32.mrf.mxu1 }
 0x1b5   : > { %v874_v3 = vpack.c.bf16 %v843_v63, %v842_v62  ;;  %v732_v7 = vadd.f32 %v1985_v53, %v731_v2  ;;  %v848_v17 = vmax.f32 %v740_v9, 0.0 }
 0x1b6   : > { %v1469_v6 = vpop.f32.mrf.mxu1 }
 0x1b7   : > { %v743_v8 = vadd.f32 %v1469_v6, %v1985_v53  ;;  %1510 = vmatprep.mubr.bf16.mxu0 %v874_v3  ;;  %v846_v15 = vmax.f32 %v732_v7, 0.0 }
 0x1b8   : > { %v734_v10 = vpop.f32.mrf.mxu1  ;;  %1511 = vmatmul.mubr.bf16.vlgmr.msra.gmra.mxu0 %v875_v4 }
 0x1b9   : > { %v735_v11 = vadd.f32 %v1985_v53, %v734_v10  ;;  %v849_v12 = vmax.f32 %v743_v8, 0.0 }
 0x1ba   : > { %v1472_v13 = vpop.f32.mrf.mxu1 }
 0x1bb   : > { %v847_v16 = vmax.f32 %v735_v11, 0.0  ;;  %v877_v20 = vpack.c.bf16 %v849_v12, %v848_v17  ;;  %v756_v25 = vadd.f32 %v1472_v13, %v1985_v53 }
 0x1bc   : > { %v747_v18 = vpop.f32.mrf.mxu1 }
 0x1bd   : > { %v876_v19 = vpack.c.bf16 %v847_v16, %v846_v15  ;;  %v748_v22 = vadd.f32 %v1985_v53, %v747_v18  ;;  %v852_v30 = vmax.f32 %v756_v25, 0.0 }
 0x1be   : > { %v1473_v21 = vpop.f32.mrf.mxu1 }
 0x1bf   : > { %v759_v24 = vadd.f32 %v1473_v21, %v1985_v53  ;;  %1514 = vmatprep.mubr.bf16.mxu0 %v876_v19  ;;  %v850_v28 = vmax.f32 %v748_v22, 0.0 }
 0x1c0   : > { %v750_v26 = vpop.f32.mrf.mxu1  ;;  %1515 = vmatmul.mubr.bf16.gmra.mxu0 %v877_v20 }
 0x1c1   : > { %v751_v5 = vadd.f32 %v1985_v53, %v750_v26  ;;  %v853_v14 = vmax.f32 %v759_v24, 0.0 }
 0x1c2   : > { %v1476_v27 = vpop.f32.mrf.mxu1 }
 0x1c3   : > { %v851_v29 = vmax.f32 %v751_v5, 0.0  ;;  %v879_v34 = vpack.c.bf16 %v853_v14, %v852_v30  ;;  %v772_v23 = vadd.f32 %v1476_v27, %v1985_v53 }
 0x1c4   : > { %v763_v31 = vpop.f32.mrf.mxu1 }
 0x1c5   : > { %v878_v33 = vpack.c.bf16 %v851_v29, %v850_v28  ;;  %v764_v36 = vadd.f32 %v1985_v53, %v763_v31  ;;  %v856_v44 = vmax.f32 %v772_v23, 0.0 }
 0x1c6   : > { %v1477_v35 = vpop.f32.mrf.mxu1 }
 0x1c7   : > { %v775_v37 = vadd.f32 %v1477_v35, %v1985_v53  ;;  %1518 = vmatprep.mubr.bf16.mxu0 %v878_v33  ;;  %v854_v42 = vmax.f32 %v764_v36, 0.0 }
 0x1c8   : > { %v766_v38 = vpop.f32.mrf.mxu1  ;;  %1519 = vmatmul.mubr.bf16.gmra.mxu0 %v879_v34 }
 0x1c9   : > { %v767_v32 = vadd.f32 %v1985_v53, %v766_v38  ;;  %v857_v39 = vmax.f32 %v775_v37, 0.0 }
 0x1ca   : > { %v1480_v40 = vpop.f32.mrf.mxu1 }
 0x1cb   : > { %v855_v43 = vmax.f32 %v767_v32, 0.0  ;;  %v881_v47 = vpack.c.bf16 %v857_v39, %v856_v44  ;;  %v788_v50 = vadd.f32 %v1480_v40, %v1985_v53  ;;  %v2022_v32 = vld [vmem:[%s2150_s6] ss:$0 sm:$0xff] }
 0x1cc   : > { %v779_v45 = vpop.f32.mrf.mxu1 }
 0x1cd   : > { %v880_v46 = vpack.c.bf16 %v855_v43, %v854_v42  ;;  %v780_v49 = vadd.f32 %v1985_v53, %v779_v45  ;;  %v860_v57 = vmax.f32 %v788_v50, 0.0 }
 0x1ce   : > { %v1481_v48 = vpop.f32.mrf.mxu1 }
 0x1cf   : > { %v791_v41 = vadd.f32 %v1481_v48, %v1985_v53  ;;  %1522 = vmatprep.mubr.bf16.mxu0 %v880_v46  ;;  %v858_v55 = vmax.f32 %v780_v49, 0.0 }
 0x1d0   : > { %v782_v1 = vpop.f32.mrf.mxu1  ;;  %1523 = vmatmul.mubr.bf16.gmra.mxu0 %v881_v47 }
 0x1d1   : > { %v783_v51 = vadd.f32 %v1985_v53, %v782_v1  ;;  %v861_v52 = vmax.f32 %v791_v41, 0.0 }
 0x1d2   : > { %v1484_v54 = vpop.f32.mrf.mxu1 }
 0x1d3   : > { %v859_v56 = vmax.f32 %v783_v51, 0.0  ;;  %v883_v60 = vpack.c.bf16 %v861_v52, %v860_v57  ;;  %v804_v0 = vadd.f32 %v1484_v54, %v1985_v53 }
 0x1d4   : > { %v795_v58 = vpop.f32.mrf.mxu1 }
 0x1d5   : > { %v882_v59 = vpack.c.bf16 %v859_v56, %v858_v55  ;;  %v796_v62 = vadd.f32 %v1985_v53, %v795_v58  ;;  %v864_v9 = vmax.f32 %v804_v0, 0.0 }
 0x1d6   : > { %v1485_v61 = vpop.f32.mrf.mxu1 }
 0x1d7   : > { %v807_v63 = vadd.f32 %v1485_v61, %v1985_v53  ;;  %1526 = vmatprep.mubr.bf16.mxu0 %v882_v59  ;;  %v862_v7 = vmax.f32 %v796_v62, 0.0 }
 0x1d8   : > { %v798_v2 = vpop.f32.mrf.mxu1  ;;  %1527 = vmatmul.mubr.bf16.gmra.mxu0 %v883_v60 }
 0x1d9   : > { %v799_v3 = vadd.f32 %v1985_v53, %v798_v2  ;;  %v865_v4 = vmax.f32 %v807_v63, 0.0 }
 0x1da   : > { %v1488_v6 = vpop.f32.mrf.mxu1 }
 0x1db   : > { %v863_v8 = vmax.f32 %v799_v3, 0.0  ;;  %v885_v12 = vpack.c.bf16 %v865_v4, %v864_v9  ;;  %v820_v17 = vadd.f32 %v1488_v6, %v1985_v53 }
 0x1dc   : > { %v811_v10 = vpop.f32.mrf.mxu1 }
 0x1dd   : > { %v884_v11 = vpack.c.bf16 %v863_v8, %v862_v7  ;;  %v812_v15 = vadd.f32 %v1985_v53, %v811_v10  ;;  %v868_v25 = vmax.f32 %v820_v17, 0.0 }
 0x1de   : > { %v1489_v13 = vpop.f32.mrf.mxu1 }
 0x1df   : > { %v823_v16 = vadd.f32 %v1489_v13, %v1985_v53  ;;  %1530 = vmatprep.mubr.bf16.mxu0 %v884_v11  ;;  %v866_v22 = vmax.f32 %v812_v15, 0.0 }
 0x1e0   : > { %v814_v18 = vpop.f32.mrf.mxu1  ;;  %1531 = vmatmul.mubr.bf16.gmra.mxu0 %v885_v12 }
 0x1e1   : > { %v815_v19 = vadd.f32 %v1985_v53, %v814_v18  ;;  %v869_v20 = vmax.f32 %v823_v16, 0.0 }
 0x1e2   : > { %v1492_v21 = vpop.f32.mrf.mxu1 }
 0x1e3   : > { %v867_v24 = vmax.f32 %v815_v19, 0.0  ;;  %v887_v14 = vpack.c.bf16 %v869_v20, %v868_v25  ;;  %v836_v30 = vadd.f32 %v1492_v21, %v1985_v53 }
 0x1e4   : > { %v827_v26 = vpop.f32.mrf.mxu1 }
 0x1e5   : > { %v886_v5 = vpack.c.bf16 %v867_v24, %v866_v22  ;;  %v828_v28 = vadd.f32 %v1985_v53, %v827_v26  ;;  %v872_v37 = vmax.f32 %v836_v30, 0.0 }
 0x1e6   : > { %v1493_v27 = vpop.f32.mrf.mxu1 }
 0x1e7   : > { %v839_v29 = vadd.f32 %v1493_v27, %v1985_v53  ;;  %1534 = vmatprep.mubr.bf16.mxu0 %v886_v5  ;;  %v870_v35 = vmax.f32 %v828_v28, 0.0 }
 0x1e8   : > { %v830_v31 = vpop.f32.mrf.mxu1  ;;  %1535 = vmatmul.mubr.bf16.gmra.mxu0 %v887_v14 }
 0x1e9   : > { %v831_v33 = vadd.f32 %v1985_v53, %v830_v31  ;;  %v873_v34 = vmax.f32 %v839_v29, 0.0 }
 0x1eb   : > { %v871_v36 = vmax.f32 %v831_v33, 0.0  ;;  %v889_v38 = vpack.c.bf16 %v873_v34, %v872_v37 }
 0x1ed   : > { %v888_v23 = vpack.c.bf16 %v871_v36, %v870_v35 }
 0x1ef   : > { %1538 = vmatprep.mubr.bf16.mxu0 %v888_v23 }
 0x1f0   : > { %1539 = vmatmul.mubr.bf16.gmra.mxu0 %v889_v38 }
 0x278   : > { %v1512_v39 = vpop.f32.mrf.mxu0 }
 0x279   : > { %v1004_v40 = vadd.f32 %v1512_v39, %v2022_v32 }
 0x27a   : > { %v995_v42 = vpop.f32.mrf.mxu0 }
 0x27b   : > { %1605 = vtanh.f32 %v1004_v40  ;;  %v996_v53 = vadd.f32 %v2022_v32, %v995_v42 }
 0x27c   : > { %v1513_v43 = vpop.f32.mrf.mxu0 }
 0x27d   : > { %1607 = vtanh.f32 %v996_v53  ;;  %v1007_v44 = vadd.f32 %v1513_v43, %v2022_v32 }
 0x27e   : > { %v998_v45 = vpop.f32.mrf.mxu0 }
 0x27f   : > { %1609 = vtanh.f32 %v1007_v44  ;;  %v999_v46 = vadd.f32 %v2022_v32, %v998_v45 }
 0x280   : > { %v1516_v47 = vpop.f32.mrf.mxu0 }
 0x281   : > { %1611 = vtanh.f32 %v999_v46  ;;  %v1020_v48 = vadd.f32 %v1516_v47, %v2022_v32 }
 0x282   : > { %v1011_v49 = vpop.f32.mrf.mxu0 }
 0x283   : > { %1613 = vtanh.f32 %v1020_v48  ;;  %v1012_v41 = vadd.f32 %v2022_v32, %v1011_v49 }
 0x284   : > { %v1517_v50 = vpop.f32.mrf.mxu0 }
 0x285   : > { %1615 = vtanh.f32 %v1012_v41  ;;  %v1023_v1 = vadd.f32 %v1517_v50, %v2022_v32 }
 0x286   : > { %v1014_v51 = vpop.f32.mrf.mxu0 }
 0x287   : > { %1617 = vtanh.f32 %v1023_v1  ;;  %v1015_v52 = vadd.f32 %v2022_v32, %v1014_v51 }
 0x288   : > { %v1606_v54 = vpop.eup %1605  ;;  %v1520_v55 = vpop.f32.mrf.mxu0 }
 0x289   : > { %v1156_v56 = vmul.f32 2.0, %v1606_v54  ;;  %1619 = vtanh.f32 %v1015_v52  ;;  %v1036_v57 = vadd.f32 %v1520_v55, %v2022_v32 }
 0x28a   : > { %v1608_v58 = vpop.eup %1607  ;;  %v1027_v59 = vpop.f32.mrf.mxu0 }
 0x28b   : > { %1188 = vst [vmem:[%s2036_s20 + $0x10] sm:$0xff] %v1156_v56  ;;  %v1154_v60 = vmul.f32 2.0, %v1608_v58  ;;  %1621 = vtanh.f32 %v1036_v57  ;;  %v1028_v61 = vadd.f32 %v2022_v32, %v1027_v59 }
 0x28c   : > { %v1610_v62 = vpop.eup %1609  ;;  %v1521_v63 = vpop.f32.mrf.mxu0 }
 0x28d   : > { %1186 = vst [vmem:[%s2036_s20] sm:$0xff] %v1154_v60  ;;  %v1157_v0 = vmul.f32 2.0, %v1610_v62  ;;  %1623 = vtanh.f32 %v1028_v61  ;;  %v1039_v2 = vadd.f32 %v1521_v63, %v2022_v32 }
 0x28e   : > { %v1612_v3 = vpop.eup %1611  ;;  %v1030_v4 = vpop.f32.mrf.mxu0 }
 0x28f   : > { %1189 = vst [vmem:[%s2036_s20 + $0x18] sm:$0xff] %v1157_v0  ;;  %v1155_v6 = vmul.f32 2.0, %v1612_v3  ;;  %1625 = vtanh.f32 %v1039_v2  ;;  %v1031_v7 = vadd.f32 %v2022_v32, %v1030_v4 }
 0x290   : > { %v1614_v8 = vpop.eup %1613  ;;  %v1524_v9 = vpop.f32.mrf.mxu0 }
 0x291   : > { %1187 = vst [vmem:[%s2036_s20 + $0x8] sm:$0xff] %v1155_v6  ;;  %v1160_v10 = vmul.f32 2.0, %v1614_v8  ;;  %1627 = vtanh.f32 %v1031_v7  ;;  %v1052_v11 = vadd.f32 %v1524_v9, %v2022_v32 }
 0x292   : > { %v1616_v12 = vpop.eup %1615  ;;  %v1043_v13 = vpop.f32.mrf.mxu0 }
 0x293   : > { %1192 = vst [vmem:[%s2036_s20 + $0x30] sm:$0xff] %v1160_v10  ;;  %v1158_v15 = vmul.f32 2.0, %v1616_v12  ;;  %1629 = vtanh.f32 %v1052_v11  ;;  %v1044_v16 = vadd.f32 %v2022_v32, %v1043_v13 }
 0x294   : > { %v1618_v17 = vpop.eup %1617  ;;  %v1525_v18 = vpop.f32.mrf.mxu0 }
 0x295   : > { %1190 = vst [vmem:[%s2036_s20 + $0x20] sm:$0xff] %v1158_v15  ;;  %v1161_v19 = vmul.f32 2.0, %v1618_v17  ;;  %1631 = vtanh.f32 %v1044_v16  ;;  %v1055_v20 = vadd.f32 %v1525_v18, %v2022_v32 }
 0x296   : > { %v1620_v21 = vpop.eup %1619  ;;  %v1046_v22 = vpop.f32.mrf.mxu0 }
 0x297   : > { %1193 = vst [vmem:[%s2036_s20 + $0x38] sm:$0xff] %v1161_v19  ;;  %v1159_v24 = vmul.f32 2.0, %v1620_v21  ;;  %1633 = vtanh.f32 %v1055_v20  ;;  %v1047_v25 = vadd.f32 %v2022_v32, %v1046_v22 }
 0x298   : > { %v1622_v26 = vpop.eup %1621  ;;  %v1528_v5 = vpop.f32.mrf.mxu0 }
 0x299   : > { %1191 = vst [vmem:[%s2036_s20 + $0x28] sm:$0xff] %v1159_v24  ;;  %v1164_v14 = vmul.f32 2.0, %v1622_v26  ;;  %1635 = vtanh.f32 %v1047_v25  ;;  %v1068_v27 = vadd.f32 %v1528_v5, %v2022_v32 }
 0x29a   : > { %v1624_v28 = vpop.eup %1623  ;;  %v1059_v29 = vpop.f32.mrf.mxu0 }
 0x29b   : > { %1196 = vst [vmem:[%s2036_s20 + $0x50] sm:$0xff] %v1164_v14  ;;  %v1162_v30 = vmul.f32 2.0, %v1624_v28  ;;  %1637 = vtanh.f32 %v1068_v27  ;;  %v1060_v31 = vadd.f32 %v2022_v32, %v1059_v29 }
 0x29c   : > { %v1626_v33 = vpop.eup %1625  ;;  %v1529_v34 = vpop.f32.mrf.mxu0 }
 0x29d   : > { %1194 = vst [vmem:[%s2036_s20 + $0x40] sm:$0xff] %v1162_v30  ;;  %v1165_v35 = vmul.f32 2.0, %v1626_v33  ;;  %1639 = vtanh.f32 %v1060_v31  ;;  %v1071_v36 = vadd.f32 %v1529_v34, %v2022_v32 }
 0x29e   : > { %v1628_v37 = vpop.eup %1627  ;;  %v1062_v23 = vpop.f32.mrf.mxu0 }
 0x29f   : > { %1197 = vst [vmem:[%s2036_s20 + $0x58] sm:$0xff] %v1165_v35  ;;  %v1163_v38 = vmul.f32 2.0, %v1628_v37  ;;  %1641 = vtanh.f32 %v1071_v36  ;;  %v1063_v39 = vadd.f32 %v2022_v32, %v1062_v23 }
 0x2a0   : > { %v1630_v40 = vpop.eup %1629  ;;  %v1532_v42 = vpop.f32.mrf.mxu0 }
 0x2a1   : > { %1195 = vst [vmem:[%s2036_s20 + $0x48] sm:$0xff] %v1163_v38  ;;  %v1168_v53 = vmul.f32 2.0, %v1630_v40  ;;  %1643 = vtanh.f32 %v1063_v39  ;;  %v1084_v43 = vadd.f32 %v1532_v42, %v2022_v32 }
 0x2a2   : > { %v1632_v44 = vpop.eup %1631  ;;  %v1075_v45 = vpop.f32.mrf.mxu0 }
 0x2a3   : > { %1200 = vst [vmem:[%s2036_s20 + $0x70] sm:$0xff] %v1168_v53  ;;  %v1166_v46 = vmul.f32 2.0, %v1632_v44  ;;  %1645 = vtanh.f32 %v1084_v43  ;;  %v1076_v47 = vadd.f32 %v2022_v32, %v1075_v45 }
 0x2a4   : > { %v1634_v48 = vpop.eup %1633  ;;  %v1533_v49 = vpop.f32.mrf.mxu0 }
 0x2a5   : > { %1198 = vst [vmem:[%s2036_s20 + $0x60] sm:$0xff] %v1166_v46  ;;  %v1169_v41 = vmul.f32 2.0, %v1634_v48  ;;  %1647 = vtanh.f32 %v1076_v47  ;;  %v1087_v50 = vadd.f32 %v1533_v49, %v2022_v32 }
 0x2a6   : > { %v1636_v1 = vpop.eup %1635  ;;  %v1078_v51 = vpop.f32.mrf.mxu0 }
 0x2a7   : > { %1201 = vst [vmem:[%s2036_s20 + $0x78] sm:$0xff] %v1169_v41  ;;  %v1167_v52 = vmul.f32 2.0, %v1636_v1  ;;  %1649 = vtanh.f32 %v1087_v50  ;;  %v1079_v54 = vadd.f32 %v2022_v32, %v1078_v51 }
 0x2a8   : > { %v1638_v55 = vpop.eup %1637  ;;  %v1536_v56 = vpop.f32.mrf.mxu0 }
 0x2a9   : > { %1199 = vst [vmem:[%s2036_s20 + $0x68] sm:$0xff] %v1167_v52  ;;  %v1172_v57 = vmul.f32 2.0, %v1638_v55  ;;  %1651 = vtanh.f32 %v1079_v54  ;;  %v1100_v58 = vadd.f32 %v1536_v56, %v2022_v32 }
 0x2aa   : > { %v1640_v59 = vpop.eup %1639  ;;  %v1091_v60 = vpop.f32.mrf.mxu0 }
 0x2ab   : > { %1204 = vst [vmem:[%s2036_s20 + $0x90] sm:$0xff] %v1172_v57  ;;  %v1170_v61 = vmul.f32 2.0, %v1640_v59  ;;  %1653 = vtanh.f32 %v1100_v58  ;;  %v1092_v62 = vadd.f32 %v2022_v32, %v1091_v60 }
 0x2ac   : > { %v1642_v63 = vpop.eup %1641  ;;  %v1537_v0 = vpop.f32.mrf.mxu0 }
 0x2ad   : > { %1202 = vst [vmem:[%s2036_s20 + $0x80] sm:$0xff] %v1170_v61  ;;  %v1173_v2 = vmul.f32 2.0, %v1642_v63  ;;  %1655 = vtanh.f32 %v1092_v62  ;;  %v1103_v3 = vadd.f32 %v1537_v0, %v2022_v32 }
 0x2ae   : > { %v1644_v4 = vpop.eup %1643  ;;  %v1094_v6 = vpop.f32.mrf.mxu0 }
 0x2af   : > { %1205 = vst [vmem:[%s2036_s20 + $0x98] sm:$0xff] %v1173_v2  ;;  %v1171_v7 = vmul.f32 2.0, %v1644_v4  ;;  %1657 = vtanh.f32 %v1103_v3  ;;  %v1095_v8 = vadd.f32 %v2022_v32, %v1094_v6 }
 0x2b0   : > { %v1646_v9 = vpop.eup %1645  ;;  %v1540_v10 = vpop.f32.mrf.mxu0 }
 0x2b1   : > { %1203 = vst [vmem:[%s2036_s20 + $0x88] sm:$0xff] %v1171_v7  ;;  %v1176_v11 = vmul.f32 2.0, %v1646_v9  ;;  %1659 = vtanh.f32 %v1095_v8  ;;  %v1116_v12 = vadd.f32 %v1540_v10, %v2022_v32 }
 0x2b2   : > { %v1648_v13 = vpop.eup %1647  ;;  %v1107_v15 = vpop.f32.mrf.mxu0 }
 0x2b3   : > { %1208 = vst [vmem:[%s2036_s20 + $0xb0] sm:$0xff] %v1176_v11  ;;  %v1174_v16 = vmul.f32 2.0, %v1648_v13  ;;  %1661 = vtanh.f32 %v1116_v12  ;;  %v1108_v17 = vadd.f32 %v2022_v32, %v1107_v15 }
 0x2b4   : > { %v1650_v18 = vpop.eup %1649  ;;  %v1541_v19 = vpop.f32.mrf.mxu0 }
 0x2b5   : > { %1206 = vst [vmem:[%s2036_s20 + $0xa0] sm:$0xff] %v1174_v16  ;;  %v1177_v20 = vmul.f32 2.0, %v1650_v18  ;;  %1663 = vtanh.f32 %v1108_v17  ;;  %v1119_v21 = vadd.f32 %v1541_v19, %v2022_v32 }
 0x2b6   : > { %v1652_v22 = vpop.eup %1651  ;;  %v1110_v24 = vpop.f32.mrf.mxu0 }
 0x2b7   : > { %1209 = vst [vmem:[%s2036_s20 + $0xb8] sm:$0xff] %v1177_v20  ;;  %v1175_v25 = vmul.f32 2.0, %v1652_v22  ;;  %1665 = vtanh.f32 %v1119_v21  ;;  %v1111_v26 = vadd.f32 %v2022_v32, %v1110_v24 }
 0x2b8   : > { %v1654_v5 = vpop.eup %1653 }
 0x2b9   : > { %1207 = vst [vmem:[%s2036_s20 + $0xa8] sm:$0xff] %v1175_v25  ;;  %v1180_v14 = vmul.f32 2.0, %v1654_v5  ;;  %1667 = vtanh.f32 %v1111_v26 }
 0x2ba   : > { %v1656_v27 = vpop.eup %1655 }
 0x2bb   : > { %1212 = vst [vmem:[%s2036_s20 + $0xd0] sm:$0xff] %v1180_v14  ;;  %v1178_v28 = vmul.f32 2.0, %v1656_v27 }
 0x2bc   : > { %v1658_v29 = vpop.eup %1657 }
 0x2bd   : > { %1210 = vst [vmem:[%s2036_s20 + $0xc0] sm:$0xff] %v1178_v28  ;;  %v1181_v30 = vmul.f32 2.0, %v1658_v29 }
 0x2be   : > { %v1660_v31 = vpop.eup %1659 }
 0x2bf   : > { %1213 = vst [vmem:[%s2036_s20 + $0xd8] sm:$0xff] %v1181_v30  ;;  %v1179_v33 = vmul.f32 2.0, %v1660_v31 }
 0x2c0   : > { %v1662_v34 = vpop.eup %1661 }
 0x2c1   : > { %1211 = vst [vmem:[%s2036_s20 + $0xc8] sm:$0xff] %v1179_v33  ;;  %v1184_v32 = vmul.f32 2.0, %v1662_v34 }
 0x2c2   : > { %v1664_v35 = vpop.eup %1663 }
 0x2c3   : > { %1216 = vst [vmem:[%s2036_s20 + $0xf0] sm:$0xff] %v1184_v32  ;;  %v1182_v36 = vmul.f32 2.0, %v1664_v35 }
 0x2c4   : > { %v1666_v37 = vpop.eup %1665 }
 0x2c5   : > { %1214 = vst [vmem:[%s2036_s20 + $0xe0] sm:$0xff] %v1182_v36  ;;  %v1185_v23 = vmul.f32 2.0, %v1666_v37 }
 0x2c6   : > { %v1668_v38 = vpop.eup %1667 }
 0x2c7   : > { %1217 = vst [vmem:[%s2036_s20 + $0xf8] sm:$0xff] %v1185_v23  ;;  %v1183_v39 = vmul.f32 2.0, %v1668_v38 }
 0x2c9   : > { %1215 = vst [vmem:[%s2036_s20 + $0xe8] sm:$0xff] %v1183_v39 }
 0x2ca   : > { %1682 = shalt.err (!%p1679_p3)
}
 0x2cb   : > { %s1683_s16 = scalar_lea.hbm %s2096_s8, 4096  ;;  %s1687_s19 = scalar_lea.hbm %s2151_s7, 8192 }
 0x2cc   : > { %p1684_p4 = scmp.ne.s32.totalorder %s2096_s8, %s1683_s16  ;;  %p1688_p9 = scmp.lt.s32.totalorder %s2096_s8, %s2151_s7 }
 0x2cd   : > { %p1689_p10 = scmp.lt.s32.totalorder %s1687_s19, %s1683_s16 }
 0x2ce   : > { %p1685_p7 = pnand %p1684_p4, %p1812_p5 }
 0x2cf   : > { %p1690_p11 = por %p1689_p10, %p1688_p9 }
 0x2d0   : > { %p1686_p8 = pneg %p1685_p7 }
 0x2d2   : > { %p1691_p12 = pnand %p1690_p11, %p1686_p8 }
 0x2d4   : > { %1694 = shalt.err (!%p1691_p12)
}
 0x2d5   : > { %s1732_s23 = smov 128   ;;  %s1733_s29 = smov 8  }
 0x2d6   : > { %1546 = dma.vmem_to_hbm [thread:$0]  (%p1812_p5), %s2098_s22, 4096, %s2096_s8, %s2104_s28, %s1732_s23, %s1732_s23, %s1733_s29  }
 0x2d7 PF: > { %p1552_p13 = scmp.ge.s32.totalorder %s1729_s27, 2  ;;  %s1247_s9 = sand.u32 1, %s1717_s24  }
 0x2d8   : > { %s1248_s13 = scalar_lea.sflag [#allocation3], %s1247_s9 }
 0x2d9   : > { %p1549_p0 = pnand %p1552_p13, %p1816_p6 }
 0x2db   : > { %p1550_p1 = pneg %p1549_p0 }
 0x2dd   : > { %1712 = dma.done.wait (%p1550_p1), %s1248_s13, 4096  }
 0x2de   : > { %1714 = vsyncadd (%p1550_p1), %s1248_s13, 4294963200  ;;  %p17_p2 = scmp.ge.s32.totalorder %s1799_s30, 4   ;;  %s2154_s24 = smov %s1721_s25 }
 0x2df   : > { %s2155_s25 = smov %s1725_s26  ;;  %s2156_s26 = smov %s1810_s10 }
 0x2e0   : > { %s2157_s27 = smov %s1799_s30  ;;  %19 = sbr.rel (!%p17_p2) target bundleno = 3 (0x3), region = 83 }
 0x2e5   :  { %1253 = vsyncpa [#allocation3], 1 }
 0x2e6   :  { %1255 = vsyncpa [#allocation3 + $0x1], 1 }

</bundles_post_ra>
